<compile_context>
chip_gen: v5e
topology: v5e:2x2
jax: 0.10.0
libtpu: 0.0.40
codegen_flags: <defaults>
</compile_context>

<pallas_src>
import math

import jax
import jax.numpy as jnp
from jax.experimental import pallas as pl
from jax.experimental.pallas import tpu as pltpu


WINDOW_SIZE = 11
SIGMA = 1.5
C1 = 0.01 ** 2
C2 = 0.03 ** 2


def _gaussian_taps(window_size: int, sigma: float):
    g = [math.exp(-((x - window_size // 2) ** 2) / (2.0 * sigma ** 2))
         for x in range(window_size)]
    s = sum(g)
    return [v / s for v in g]


def _toeplitz_left(n: int, window_size: int, taps):
    """T such that (T @ X) == zero-padded 'same' cross-correlation along rows."""
    pad = window_size // 2
    rows = []
    for i in range(n):
        row = []
        for r in range(n):
            k = r - i + pad
            row.append(taps[k] if 0 <= k < window_size else 0.0)
        rows.append(row)
    return jnp.array(rows, dtype=jnp.float32)


def _toeplitz_right(n: int, window_size: int, taps):
    """T such that (X @ T) == zero-padded 'same' cross-correlation along columns."""
    pad = window_size // 2
    rows = []
    for i in range(n):
        row = []
        for j in range(n):
            k = i - j + pad
            row.append(taps[k] if 0 <= k < window_size else 0.0)
        rows.append(row)
    return jnp.array(rows, dtype=jnp.float32)


def _make_ssim_kernel(H: int, CW: int):
    """Kernel processing one batch element: (H, C*W) slabs for gt and pred."""

    def kernel(th_ref, twbd_ref, gt_ref, pr_ref, out_ref):
        th = th_ref[...]           # (H, H)      Gaussian conv over H (left mult)
        twbd = twbd_ref[...]       # (CW, CW)    block-diag Gaussian conv over W (right mult)
        gt = gt_ref[...].astype(jnp.float32)   # (H, CW)
        pr = pr_ref[...].astype(jnp.float32)   # (H, CW)

        def conv(x):
            # depthwise Gaussian "same" conv == T_h @ X @ blockdiag(T_w), on the MXU.
            y = jnp.dot(th, x, preferred_element_type=jnp.float32)
            return jnp.dot(y, twbd, preferred_element_type=jnp.float32)

        mu1 = conv(gt)
        mu2 = conv(pr)
        s12 = conv(gt * pr)
        # NOTE: sigma1 / sigma2 (conv of x*x) in the PyTorch module are never used
        # in ssim_map -> skipped.

        mu1mu2 = mu1 * mu2
        sq_sum = mu1 * mu1 + mu2 * mu2
        sigma12 = s12 - mu1mu2

        num = (2.0 * mu1mu2 + C1) * (2.0 * sigma12 + C2)
        den = (sq_sum + C1) * (sq_sum + C2)
        ssim_map = num * pl.reciprocal(den, approx=False)

        # one lane-dense (1, 128) store per grid step; final reduce happens in JAX.
        out_ref[...] = jnp.broadcast_to(jnp.sum(ssim_map), (1, 128))

    return kernel


def ssim_loss(x_gt: jax.Array, x_pred: jax.Array,
              window_size: int = WINDOW_SIZE, size_average: bool = True):
    """Pallas SSIM loss, semantics of SSIMLoss.forward (NCHW inputs)."""
    B, C, H, W = x_gt.shape
    taps = _gaussian_taps(window_size, SIGMA)

    # Banded Toeplitz operators with the conv zero-padding folded in.
    t_h = _toeplitz_left(H, window_size, taps)                       # (H, H)
    t_w = _toeplitz_right(W, window_size, taps)                      # (W, W)
    tw_bd = jnp.kron(jnp.eye(C, dtype=jnp.float32), t_w)             # (C*W, C*W)

    CW = C * W
    # Lane-dense repack: NCHW -> (B, H, C*W).  Layout plumbing only (no compute).
    gt2 = jnp.transpose(x_gt, (0, 2, 1, 3)).reshape(B, H, CW)
    pr2 = jnp.transpose(x_pred, (0, 2, 1, 3)).reshape(B, H, CW)

    kernel = _make_ssim_kernel(H, CW)

    img_spec = pl.BlockSpec((None, H, CW), lambda b: (b, 0, 0))
    th_spec = pl.BlockSpec((H, H), lambda b: (0, 0))
    twbd_spec = pl.BlockSpec((CW, CW), lambda b: (0, 0))

    sums = pl.pallas_call(
        kernel,
        out_shape=jax.ShapeDtypeStruct((B, 1, 128), jnp.float32),
        grid_spec=pltpu.PrefetchScalarGridSpec(
            num_scalar_prefetch=0,
            grid=(B,),
            in_specs=[th_spec, twbd_spec, img_spec, img_spec],
            out_specs=pl.BlockSpec((None, 1, 128), lambda b: (b, 0, 0)),
        ),
        compiler_params=pltpu.CompilerParams(
            dimension_semantics=("parallel",),
            vmem_limit_bytes=64 * 1024 * 1024),
    )(t_h, tw_bd, gt2, pr2)

    per_batch = sums[:, 0, 0]                      # per-batch ssim_map sums
    if size_average:
        return jnp.sum(per_batch) / jnp.float32(B * C * H * W)
    return per_batch / jnp.float32(C * H * W)


# -------- pure-JAX reference (correctness check only) --------
def _ref_ssim_loss(x_gt, x_pred, window_size=WINDOW_SIZE, size_average=True):
    B, C, H, W = x_gt.shape
    pad = window_size // 2
    g = jnp.asarray(_gaussian_taps(window_size, SIGMA), dtype=jnp.float32)
    w2d = jnp.outer(g, g)
    w = jnp.broadcast_to(w2d, (C, 1, window_size, window_size))

    def conv(x):
        return jax.lax.conv_general_dilated(
            x, w, window_strides=(1, 1), padding=[(pad, pad), (pad, pad)],
            dimension_numbers=("NCHW", "OIHW", "NCHW"),
            feature_group_count=C)

    mu1 = conv(x_gt)
    mu2 = conv(x_pred)
    sq1 = mu1 ** 2
    sq2 = mu2 ** 2
    sigma = conv(x_gt * x_pred) - mu1 * mu2
    ssim_map = (2 * (mu1 * mu2) + C1) * (2 * sigma + C2) / (
        (sq1 + sq2 + C1) * (sq1 + sq2 + C2))
    if size_average:
        return jnp.mean(ssim_map)
    return jnp.mean(ssim_map, axis=(1, 2, 3))


if __name__ == "__main__":
    key = jax.random.PRNGKey(0)
    k1, k2 = jax.random.split(key)
    B, C, H, W = 2, 4, 16, 16
    x_gt = jax.random.uniform(k1, (B, C, H, W), dtype=jnp.float32)
    x_pred = jax.random.uniform(k2, (B, C, H, W), dtype=jnp.float32)

    out = ssim_loss(x_gt, x_pred)
    out = jax.block_until_ready(out)

    ref = _ref_ssim_loss(x_gt, x_pred)
    assert jnp.allclose(out, ref, rtol=1e-4, atol=1e-5), (out, ref)

    # also exercise the size_average=False path
    out_b = jax.block_until_ready(ssim_loss(x_gt, x_pred, size_average=False))
    ref_b = _ref_ssim_loss(x_gt, x_pred, size_average=False)
    assert jnp.allclose(out_b, ref_b, rtol=1e-4, atol=1e-5), (out_b, ref_b)

    print("KERNEL_OK")
</pallas_src>

<mosaic_0001>
module attributes {stable_mosaic.version = 11 : i64} {
  func.func @kernel(%arg0: i32, %arg1: memref<16x16xf32, #tpu.memory_space<vmem>>, %arg2: memref<64x64xf32, #tpu.memory_space<vmem>>, %arg3: memref<1x16x64xf32, #tpu.memory_space<vmem>>, %arg4: memref<1x16x64xf32, #tpu.memory_space<vmem>>, %arg5: memref<1x1x128xf32, #tpu.memory_space<vmem>>) attributes {dimension_semantics = [#tpu.dimension_semantics<parallel>], iteration_bounds = array<i64: 2>, scalar_prefetch = 0 : i64, scratch_operands = 0 : i64, tpu.core_type = #tpu.core_type<tc>, window_params = [{pipeline_mode = #tpu.pipeline_mode<synchronous>, transform_indices = @transform_0, window_bounds = array<i64: 16, 16>}, {pipeline_mode = #tpu.pipeline_mode<synchronous>, transform_indices = @transform_1, window_bounds = array<i64: 64, 64>}, {transform_indices = @transform_2, window_bounds = array<i64: 1, 16, 64>}, {transform_indices = @transform_3, window_bounds = array<i64: 1, 16, 64>}, {transform_indices = @transform_4, window_bounds = array<i64: 1, 1, 128>}]} {
    %c0 = arith.constant 0 : index
    %c0_0 = arith.constant 0 : index
    %0 = vector.load %arg1[%c0, %c0_0] : memref<16x16xf32, #tpu.memory_space<vmem>>, vector<16x16xf32>
    %c0_1 = arith.constant 0 : index
    %c0_2 = arith.constant 0 : index
    %1 = vector.load %arg2[%c0_1, %c0_2] : memref<64x64xf32, #tpu.memory_space<vmem>>, vector<64x64xf32>
    %c0_3 = arith.constant 0 : index
    %c0_4 = arith.constant 0 : index
    %c0_5 = arith.constant 0 : index
    %2 = vector.load %arg3[%c0_3, %c0_4, %c0_5] : memref<1x16x64xf32, #tpu.memory_space<vmem>>, vector<1x16x64xf32>
    %3 = vector.shape_cast %2 : vector<1x16x64xf32> to vector<16x64xf32>
    %c0_6 = arith.constant 0 : index
    %c0_7 = arith.constant 0 : index
    %c0_8 = arith.constant 0 : index
    %4 = vector.load %arg4[%c0_6, %c0_7, %c0_8] : memref<1x16x64xf32, #tpu.memory_space<vmem>>, vector<1x16x64xf32>
    %5 = vector.shape_cast %4 : vector<1x16x64xf32> to vector<16x64xf32>
    %cst = arith.constant dense<0.000000e+00> : vector<16x64xf32>
    %6 = tpu.matmul %0, %3, %cst {dimension_numbers = #tpu.dot_dimension_numbers<[1], [0], [0], [1], [0, 0, 1, 1], [], []>} : vector<16x16xf32>, vector<16x64xf32>, vector<16x64xf32> -> vector<16x64xf32>
    %cst_9 = arith.constant dense<0.000000e+00> : vector<16x64xf32>
    %7 = tpu.matmul %6, %1, %cst_9 {dimension_numbers = #tpu.dot_dimension_numbers<[1], [0], [0], [1], [0, 0, 1, 1], [], []>} : vector<16x64xf32>, vector<64x64xf32>, vector<16x64xf32> -> vector<16x64xf32>
    %cst_10 = arith.constant dense<0.000000e+00> : vector<16x64xf32>
    %8 = tpu.matmul %0, %5, %cst_10 {dimension_numbers = #tpu.dot_dimension_numbers<[1], [0], [0], [1], [0, 0, 1, 1], [], []>} : vector<16x16xf32>, vector<16x64xf32>, vector<16x64xf32> -> vector<16x64xf32>
    %cst_11 = arith.constant dense<0.000000e+00> : vector<16x64xf32>
    %9 = tpu.matmul %8, %1, %cst_11 {dimension_numbers = #tpu.dot_dimension_numbers<[1], [0], [0], [1], [0, 0, 1, 1], [], []>} : vector<16x64xf32>, vector<64x64xf32>, vector<16x64xf32> -> vector<16x64xf32>
    %10 = arith.mulf %3, %5 : vector<16x64xf32>
    %cst_12 = arith.constant dense<0.000000e+00> : vector<16x64xf32>
    %11 = tpu.matmul %0, %10, %cst_12 {dimension_numbers = #tpu.dot_dimension_numbers<[1], [0], [0], [1], [0, 0, 1, 1], [], []>} : vector<16x16xf32>, vector<16x64xf32>, vector<16x64xf32> -> vector<16x64xf32>
    %cst_13 = arith.constant dense<0.000000e+00> : vector<16x64xf32>
    %12 = tpu.matmul %11, %1, %cst_13 {dimension_numbers = #tpu.dot_dimension_numbers<[1], [0], [0], [1], [0, 0, 1, 1], [], []>} : vector<16x64xf32>, vector<64x64xf32>, vector<16x64xf32> -> vector<16x64xf32>
    %13 = arith.mulf %7, %9 : vector<16x64xf32>
    %14 = arith.mulf %7, %7 : vector<16x64xf32>
    %15 = arith.mulf %9, %9 : vector<16x64xf32>
    %16 = arith.addf %14, %15 : vector<16x64xf32>
    %17 = arith.subf %12, %13 : vector<16x64xf32>
    %cst_14 = arith.constant 2.000000e+00 : f32
    %18 = vector.broadcast %cst_14 : f32 to vector<16x64xf32>
    %19 = arith.mulf %18, %13 : vector<16x64xf32>
    %cst_15 = arith.constant 9.99999974E-5 : f32
    %20 = vector.broadcast %cst_15 : f32 to vector<16x64xf32>
    %21 = arith.addf %19, %20 : vector<16x64xf32>
    %cst_16 = arith.constant 2.000000e+00 : f32
    %22 = vector.broadcast %cst_16 : f32 to vector<16x64xf32>
    %23 = arith.mulf %22, %17 : vector<16x64xf32>
    %cst_17 = arith.constant 8.99999984E-4 : f32
    %24 = vector.broadcast %cst_17 : f32 to vector<16x64xf32>
    %25 = arith.addf %23, %24 : vector<16x64xf32>
    %26 = arith.mulf %21, %25 : vector<16x64xf32>
    %cst_18 = arith.constant 9.99999974E-5 : f32
    %27 = vector.broadcast %cst_18 : f32 to vector<16x64xf32>
    %28 = arith.addf %16, %27 : vector<16x64xf32>
    %cst_19 = arith.constant 8.99999984E-4 : f32
    %29 = vector.broadcast %cst_19 : f32 to vector<16x64xf32>
    %30 = arith.addf %16, %29 : vector<16x64xf32>
    %31 = arith.mulf %28, %30 : vector<16x64xf32>
    %32 = tpu.reciprocal %31 : vector<16x64xf32> -> vector<16x64xf32>
    %33 = arith.mulf %26, %32 : vector<16x64xf32>
    %34 = vector.shape_cast %33 : vector<16x64xf32> to vector<1x16x64xf32>
    %cst_20 = arith.constant dense<0.000000e+00> : vector<1xf32>
    %35 = vector.multi_reduction <add>, %34, %cst_20 [1, 2] : vector<1x16x64xf32> to vector<1xf32>
    %36 = vector.shape_cast %35 : vector<1xf32> to vector<1x1x1xf32>
    %37 = vector.extract %36[0, 0, 0] : f32 from vector<1x1x1xf32>
    %38 = vector.broadcast %37 : f32 to vector<1x128xf32>
    %c0_21 = arith.constant 0 : index
    %c0_22 = arith.constant 0 : index
    %c0_23 = arith.constant 0 : index
    %39 = vector.load %arg5[%c0_21, %c0_22, %c0_23] : memref<1x1x128xf32, #tpu.memory_space<vmem>>, vector<1x1x128xf32>
    %40 = vector.shape_cast %39 : vector<1x1x128xf32> to vector<1x128xf32>
    %41 = vector.shape_cast %38 : vector<1x128xf32> to vector<1x1x128xf32>
    tpu.vector_store %arg5[%c0_21, %c0_22, %c0_23], %41 {strides = array<i32>} : memref<1x1x128xf32, #tpu.memory_space<vmem>>, vector<1x1x128xf32>,
    return
  }
  func.func @transform_0(%arg0: i32) -> (i32, i32) {
    %c0_i32 = arith.constant 0 : i32
    %c0_i32_0 = arith.constant 0 : i32
    %c0_i32_1 = arith.constant 0 : i32
    return %c0_i32, %c0_i32_0 : i32, i32
  }
  func.func @transform_1(%arg0: i32) -> (i32, i32) {
    %c0_i32 = arith.constant 0 : i32
    %c0_i32_0 = arith.constant 0 : i32
    %c0_i32_1 = arith.constant 0 : i32
    return %c0_i32, %c0_i32_0 : i32, i32
  }
  func.func @transform_2(%arg0: i32) -> (i32, i32, i32) {
    %c0_i32 = arith.constant 0 : i32
    %c0_i32_0 = arith.constant 0 : i32
    %c0_i32_1 = arith.constant 0 : i32
    return %arg0, %c0_i32, %c0_i32_0 : i32, i32, i32
  }
  func.func @transform_3(%arg0: i32) -> (i32, i32, i32) {
    %c0_i32 = arith.constant 0 : i32
    %c0_i32_0 = arith.constant 0 : i32
    %c0_i32_1 = arith.constant 0 : i32
    return %arg0, %c0_i32, %c0_i32_0 : i32, i32, i32
  }
  func.func @transform_4(%arg0: i32) -> (i32, i32, i32) {
    %c0_i32 = arith.constant 0 : i32
    %c0_i32_0 = arith.constant 0 : i32
    %c0_i32_1 = arith.constant 0 : i32
    return %arg0, %c0_i32, %c0_i32_0 : i32, i32, i32
  }
}

</mosaic_0001>

<bundles_post_ra>
// kernel: tpu_custom_call.1
= control target key start
LH: loop header
LB: loop body
LE: loop exit
PB: predicated region body
PF: predicated region fallthrough
CT: control target
= control target key end

     0   :  { %s1204_s0 = inlined_call_operand.hbm [shape: f32[16,16], index: 0, kind: input, shape index: {}]   ;;  %s1205_s1 = inlined_call_operand.hbm [shape: f32[64,64], index: 1, kind: input, shape index: {}]   ;;  %s1206_s2 = inlined_call_operand.hbm [shape: f32[2,16,64], index: 2, kind: input, shape index: {}]   ;;  %s1207_s3 = inlined_call_operand.hbm [shape: f32[2,16,64], index: 3, kind: input, shape index: {}]   ;;  %s1208_s4 = inlined_call_operand.hbm [shape: f32[2,1,128], index: 4, kind: output, shape index: {}]  }
   0x1   :  { %1215 = sst [smem:[#allocation15_spill]] %s1204_s0 }
   0x2   :  { %1216 = sst [smem:[#allocation16_spill]] %s1205_s1 }
   0x3   :  { %1217 = sst [smem:[#allocation17_spill]] %s1206_s2 }
   0x4   :  { %9 = vsyncpa [#allocation3], 0 }
   0x5   :  { %10 = vsyncpa [#allocation6], 0 }
   0x6   :  { %11 = vsyncpa [#allocation4], 0 }
   0x7   :  { %13 = vsyncpa [#allocation4 + $0x1], 0  ;;  %s992_s15 = smov 0   ;;  %s994_s16 = smov 0  }
   0x8   :  { %s996_s17 = smov 0   ;;  %s998_s18 = smov 0  }
   0x9 LB: > { %s1013_s19 = sadd.s32 4294967295, %s961_s18   ;;  %s655_s20 = sadd.s32 4294967294, %s961_s18   ;;  %s961_s18 = sphi %s998_s18, %s1240_s18   ;;  %s957_s17 = sphi %s996_s17, %s1239_s17   ;;  %s953_s16 = sphi %s994_s16, %s1238_s16   ;;  %s949_s15 = sphi %s992_s15, %s1237_s15  }
   0xa   : > { %p81_p0 = scmp.ne.s32.totalorder %s953_s16, %s949_s15  ;;  %p1214_p1 = scmp.eq.s32.totalorder %s1013_s19, 0 }
   0xb   : > { %p131_p2 = scmp.eq.s32.totalorder %s1013_s19, 1  ;;  %p137_p3 = scmp.eq.s32.totalorder %s655_s20, 1 }
   0xc   : > { %p1022_p4 = por %p1214_p1, %p81_p0  ;;  %p656_p5 = scmp.ge.s32.totalorder %s961_s18, 1 }
   0xd   : > { %p1027_p6 = por %p137_p3, %p81_p0  ;;  %p144_p7 = scmp.lt.s32.totalorder %s961_s18, 3 }
   0xe   : > { %s1220_s0 = sld [smem:[#allocation15_spill]]  ;;  %s963_s27 = smov [#allocation2]  }
   0xf   : > { %p1035_p8 = pnand %p656_p5, %p144_p7  ;;  %s157_s28 = sshll.u32 %s963_s27, 4  ;;  %s158_s28 = int_to_ptr.vmem [resolvable:$true] %s157_s28 }
  0x10   : > { %s1049_s30 = sadd.s32 1, %s961_s18   ;;  %s1209_s5 = smov 128  }
  0x11   : > { %p703_p9 = pneg %p1035_p8  ;;  %s1211_s6 = smov 8  }
  0x12   : > { %s65_s7 = ssub.s32 %s961_s18, %s1049_s30  ;;  %s68_s8 = sadd.s32 1, %s957_s17 }
  0x13   : > { %p1043_p10 = pnand %p703_p9, %p1214_p1  ;;  %p66_p12 = scmp.eq.s32.totalorder %s65_s7, 0 }
  0x14   : > { %s155_s25 = sshll.u32 %s1220_s0, 4  ;;  %p75_p13 = scmp.ne.s32.totalorder %s957_s17, %s953_s16  ;;  %s156_s25 = int_to_ptr.hbm [resolvable:$true] %s155_s25 }
  0x15   : > { %706 = dma.hbm_to_vmem [thread:$0]  (!%p1043_p10), %s156_s25, 256, %s158_s28, [#allocation3], %s1209_s5, %s1209_s5, %s1211_s6  }
  0x16   : > { %p76_p0 = scmp.eq.s32.totalorder %s961_s18, 0  ;;  %p723_p3 = scmp.lt.s32.totalorder %s961_s18, 2 }
  0x17   : > { %s1064_s9 = scalar_select %p66_p12, %s957_s17, %s68_s8  }
  0x18   : > { %p77_p5 = por %p76_p0, %p75_p13  ;;  %p1068_p7 = por %p131_p2, %p75_p13 }
  0x19   : > { %1223 = sst [smem:[#allocation14_spill]] %s1064_s9  ;;  %s185_s11 = sand.u32 1, %s961_s18  }
  0x1a   : > { %s187_s12 = sand.u32 1, %s957_s17   ;;  %s1213_s14 = sshll.u32 %s961_s18, 4 }
  0x1b   : > { %s1074_s13 = sshll.u32 %s187_s12, 4  ;;  %s1225_s2 = sld [smem:[#allocation17_spill]] }
  0x1c   : > { %s189_s25 = scalar_lea.vmem [#allocation7], %s1074_s13  ;;  %p1085_p2 = pnand %p723_p3, %p77_p5 }
  0x1d   : > { %s197_s27 = sshll.u32 %s189_s25, 4  ;;  %s1227_s1 = sld [smem:[#allocation16_spill]]  ;;  %s198_s27 = int_to_ptr.vmem [resolvable:$true] %s197_s27 }
  0x1e   : > { %s1092_s6 = scalar_lea.sflag [#allocation3], %s185_s11  ;;  %p801_p12 = pneg %p1085_p2 }
  0x21   : > { %s194_s24 = scalar_lea.hbm %s1225_s2, %s1213_s14  ;;  %s804_s8 = scalar_lea.hbm %s1225_s2, 32 }
  0x22   : > { %s195_s28 = sshll.u32 %s194_s24, 4  ;;  %s196_s28 = int_to_ptr.hbm [resolvable:$true] %s195_s28 }
  0x23   : > { %s169_s5 = sshll.u32 %s1227_s1, 4  ;;  %s797_s20 = sshra.s32 %s196_s28, 4  ;;  %s170_s5 = int_to_ptr.hbm [resolvable:$true] %s169_s5  ;;  %s798_s20 = int_to_ptr.hbm [resolvable:$true] %s797_s20 }
  0x24   : > { %s799_s23 = scalar_lea.hbm %s798_s20, 16  ;;  %p805_p3 = scmp.lt.s32.totalorder %s798_s20, %s1225_s2 }
  0x25   : > { %p800_p9 = scmp.ne.s32.totalorder %s798_s20, %s799_s23  ;;  %p806_p5 = scmp.lt.s32.totalorder %s804_s8, %s799_s23 }
  0x27   : > { %p802_p13 = pnand %p801_p12, %p800_p9  ;;  %p807_p11 = por %p806_p5, %p805_p3 }
  0x29   : > { %p803_p0 = pneg %p802_p13 }
  0x2b   : > { %p808_p1 = pnand %p807_p11, %p803_p0 }
  0x2d   : > { %811 = shalt.err (!%p808_p1)
}
  0x2e   : > { %s1228_s11 = smov 8   ;;  %s1229_s0 = smov 128  }
  0x2f   : > { %713 = dma.hbm_to_vmem [thread:$0]  (!%p1085_p2), %s196_s28, 256, %s198_s27, %s1092_s6, %s1229_s0, %s1229_s0, %s1228_s11  }
  0x30   : > { %s966_s24 = smov [#allocation5]   ;;  %s1230_s14 = sshll.u32 %s961_s18, 4 }
  0x31   : > { %s171_s25 = sshll.u32 %s966_s24, 4  ;;  %s216_s8 = scalar_lea.hbm %s1207_s3, %s1230_s14  ;;  %s172_s25 = int_to_ptr.vmem [resolvable:$true] %s171_s25 }
  0x32   : > { %709 = dma.hbm_to_vmem [thread:$0]  (!%p1043_p10), %s170_s5, 1024, %s172_s25, [#allocation6], %s1229_s0, %s1229_s0, %s1228_s11  }
  0x33   : > { %s217_s12 = sshll.u32 %s216_s8, 4  ;;  %s211_s1 = scalar_lea.vmem [#allocation8], %s1074_s13  ;;  %s218_s12 = int_to_ptr.hbm [resolvable:$true] %s217_s12 }
  0x34   : > { %s219_s2 = sshll.u32 %s211_s1, 4  ;;  %s857_s9 = sshra.s32 %s218_s12, 4  ;;  %s220_s2 = int_to_ptr.vmem [resolvable:$true] %s219_s2  ;;  %s858_s9 = int_to_ptr.hbm [resolvable:$true] %s857_s9 }
  0x35   : > { %s859_s27 = scalar_lea.hbm %s858_s9, 16  ;;  %s864_s29 = scalar_lea.hbm %s1207_s3, 32 }
  0x36   : > { %p860_p1 = scmp.ne.s32.totalorder %s858_s9, %s859_s27  ;;  %p865_p10 = scmp.lt.s32.totalorder %s858_s9, %s1207_s3 }
  0x37   : > { %p866_p13 = scmp.lt.s32.totalorder %s864_s29, %s859_s27 }
  0x38   : > { %p862_p11 = pnand %p860_p1, %p801_p12 }
  0x39   : > { %p867_p0 = por %p866_p13, %p865_p10 }
  0x3a   : > { %p863_p9 = pneg %p862_p11 }
  0x3c   : > { %p868_p3 = pnand %p867_p0, %p863_p9 }
  0x3e   : > { %871 = shalt.err (!%p868_p3)
}
  0x3f   : > { %716 = dma.hbm_to_vmem [thread:$0]  (!%p1085_p2), %s218_s12, 256, %s220_s2, %s1092_s6, %s1229_s0, %s1229_s0, %s1228_s11  }
  0x40   : > { %231 = sbr.rel (%p1035_p8) target bundleno = 567 (0x237), region = 36  ;;  %p1231_p12 = scmp.eq.s32.totalorder (!%p1035_p8), %s1013_s19, 0 }
  0x45   : > { %932 = dma.done.wait (%p1231_p12), [#allocation3], 256   ;;  %p1232_p5 = pmov %p1231_p12 }
  0x47   : > { %934 = vsyncadd (%p1232_p5), [#allocation3], 4294967040  ;;  %p1233_p1 = pmov %p1232_p5 }
  0x49   : > { %936 = dma.done.wait (%p1233_p1), [#allocation6], 1024   ;;  %p1234_p11 = pmov %p1233_p1 }
  0x4a   : > { %s243_s1 = sand.u32 1, %s1013_s19   ;;  %s1149_s0 = sand.u32 1, %s953_s16  }
  0x4b   : > { %938 = vsyncadd (%p1234_p11), [#allocation6], 4294966272  ;;  %s669_s2 = sshll.u32 %s1149_s0, 4  ;;  %s244_s26 = scalar_lea.sflag [#allocation3], %s243_s1 }
  0x4c   : > { %s247_s5 = scalar_lea.vmem [#allocation7], %s669_s2 }
  0x4d   : > { %940 = dma.done.wait (%p1022_p4), %s244_s26, 512  }
  0x4e   : > { %942 = vsyncadd (%p1022_p4), %s244_s26, 4294966784  ;;  %v298_v0 = vld [vmem:[%s247_s5 + $0x8] sm:$0xff]  ;;  %s257_s6 = scalar_lea.vmem [#allocation8], %s669_s2  ;;  %v297_v2 = vld [vmem:[%s247_s5] sm:$0xff]  ;;  %vm301_vm0 = vcmask 130048   ;;  %vm331_vm1 = vcmask 523264   ;;  %s546_s13 = scalar_lea.hbm %s1208_s4, %s1013_s19 }
  0x4f   : > { %v300_v1 = vld [vmem:[%s257_s6 + $0x8] sm:$0xff]  ;;  %322 = vmatpush.msra.mxu0 %v298_v0  ;;  %v299_v3 = vld [vmem:[%s257_s6] sm:$0xff]  ;;  %s286_s7 = scalar_lea.vmem [#allocation9], %s1149_s0  ;;  %s550_s25 = sshll.u32 %s546_s13, 4  ;;  %s551_s25 = int_to_ptr.hbm [resolvable:$true] %s550_s25 }
  0x50   : > { %375 = vmatpush.msra.mxu2 %v300_v1  ;;  %v287_v4 = vld [vmem:[#allocation2] sm:$0xff]  ;;  %v414_v5 = vmul.f32 %v300_v1, %v298_v0  ;;  %v296_v6 = vld [vmem:[#allocation5 + $0x38] sm:$0xff]  ;;  %v413_v7 = vmul.f32 %v299_v3, %v297_v2  ;;  %v294_v9 = vld [vmem:[#allocation5 + $0x28] sm:$0xff]  ;;  %s548_s11 = sshll.u32 %s286_s7, 4  ;;  %s538_s8 = scalar_lea.sflag [#allocation4], %s1149_s0  ;;  %s549_s11 = int_to_ptr.vmem [resolvable:$true] %s548_s11 }
  0x51   : > { %323 = vmatpush.msra.mxu0 %v297_v2  ;;  %v295_v8 = vld [vmem:[#allocation5 + $0x30] sm:$0xff]  ;;  %398 = vmatpush.msra.mxu3 %v296_v6  ;;  %v293_v10 = vld [vmem:[#allocation5 + $0x20] sm:$0xff]  ;;  %v288_v11 = vld [vmem:[#allocation2 + $0x8] sm:$0xff]  ;;  %s901_s12 = sshra.s32 %s551_s25, 4  ;;  %s907_s19 = scalar_lea.hbm %s1208_s4, 2  ;;  %s902_s12 = int_to_ptr.hbm [resolvable:$true] %s901_s12 }
  0x52   : > { %376 = vmatpush.msra.mxu2 %v299_v3  ;;  %671 = vmatmul.msk.f32.vlgmr.msra.gmra.mxu0 %vm301_vm0, %v287_v4  ;;  %v292_v12 = vld [vmem:[#allocation5 + $0x18] sm:$0xff]  ;;  %v291_v13 = vld [vmem:[#allocation5 + $0x10] sm:$0xff]  ;;  %v290_v14 = vld [vmem:[#allocation5 + $0x8] sm:$0xff]  ;;  %s903_s27 = scalar_lea.hbm %s902_s12, 1  ;;  %p908_p9 = scmp.lt.s32.totalorder %s902_s12, %s1208_s4 }
  0x53   : > { %675 = vmatmul.msk.f32.vlgmr.msra.gmra.mxu2 %vm301_vm0, %v287_v4  ;;  %429 = vmatpush.msrb.mxu0 %v414_v5  ;;  %v289_v15 = vld [vmem:[#allocation5] sm:$0xff]  ;;  %p904_p4 = scmp.ne.s32.totalorder %s902_s12, %s903_s27  ;;  %p909_p10 = scmp.lt.s32.totalorder %s907_s19, %s903_s27 }
  0x54   : > { %346 = vmatpush.msra.mxu1 %v296_v6  ;;  %452 = vmatpush.msrb.mxu2 %v296_v6 }
  0x55   : > { %430 = vmatpush.msrb.mxu0 %v413_v7  ;;  %399 = vmatpush.msra.mxu3 %v295_v8  ;;  %p905_p8 = pnand %p904_p4, %p1068_p7  ;;  %p910_p13 = por %p909_p10, %p908_p9 }
  0x56   : > { %347 = vmatpush.msra.mxu1 %v295_v8  ;;  %453 = vmatpush.msrb.mxu2 %v295_v8 }
  0x57   : > { %400 = vmatpush.msra.mxu3 %v294_v9  ;;  %p906_p2 = pneg %p905_p8 }
  0x58   : > { %348 = vmatpush.msra.mxu1 %v294_v9  ;;  %454 = vmatpush.msrb.mxu2 %v294_v9 }
  0x59   : > { %401 = vmatpush.msra.mxu3 %v293_v10  ;;  %p911_p0 = pnand %p910_p13, %p906_p2 }
  0x5a   : > { %672 = vmatmul.msk.f32.gmra.mxu0 %vm301_vm0, %v288_v11  ;;  %349 = vmatpush.msra.mxu1 %v293_v10 }
  0x5b   : > { %676 = vmatmul.msk.f32.gmra.mxu2 %vm301_vm0, %v288_v11  ;;  %402 = vmatpush.msra.mxu3 %v292_v12 }
  0x5c   : > { %455 = vmatpush.msrb.mxu2 %v293_v10  ;;  %350 = vmatpush.msra.mxu1 %v292_v12 }
  0x5d   : > { %403 = vmatpush.msra.mxu3 %v291_v13 }
  0x5e   : > { %456 = vmatpush.msrb.mxu2 %v292_v12  ;;  %351 = vmatpush.msra.mxu1 %v291_v13 }
  0x5f   : > { %404 = vmatpush.msra.mxu3 %v290_v14 }
  0x60   : > { %457 = vmatpush.msrb.mxu2 %v291_v13  ;;  %352 = vmatpush.msra.mxu1 %v290_v14 }
  0x61   : > { %405 = vmatpush.msra.mxu3 %v289_v15 }
  0x62   : > { %679 = vmatmul.msk.f32.vlgmr.msrb.gmra.mxu0 %vm301_vm0, %v287_v4  ;;  %458 = vmatpush.msrb.mxu2 %v290_v14 }
  0x63   : > { %353 = vmatpush.msra.mxu1 %v289_v15 }
  0x64   : > { %459 = vmatpush.msrb.mxu2 %v289_v15 }
  0x6a   : > { %680 = vmatmul.msk.f32.gmra.mxu0 %vm301_vm0, %v288_v11 }
  0xcf   : > { %v325_v16 = vpop.f32.mrf.mxu0 }
  0xd0   : > { %673 = vmatmul.msk.f32.vlgmr.msra.gmra.mxu1 %vm331_vm1, %v325_v16 }
  0xd6   : > { %v378_v17 = vpop.f32.mrf.mxu2 }
  0xd7   : > { %677 = vmatmul.msk.f32.vlgmr.msra.gmra.mxu3 %vm331_vm1, %v378_v17  ;;  %v328_v18 = vpop.f32.mrf.mxu0 }
  0xd8   : > { %674 = vmatmul.msk.f32.gmra.mxu1 %vm331_vm1, %v328_v18 }
  0xde   : > { %v381_v19 = vpop.f32.mrf.mxu2 }
  0xdf   : > { %678 = vmatmul.msk.f32.gmra.mxu3 %vm331_vm1, %v381_v19  ;;  %v432_v20 = vpop.f32.mrf.mxu0 }
  0xe0   : > { %681 = vmatmul.msk.f32.vlgmr.msrb.gmra.mxu2 %vm331_vm1, %v432_v20 }
  0xe7   : > { %v435_v21 = vpop.f32.mrf.mxu0 }
  0xe8   : > { %682 = vmatmul.msk.f32.gmra.mxu2 %vm331_vm1, %v435_v21 }
 0x14d   : > { %v355_v22 = vpop.f32.mrf.mxu1 }
 0x14e   : > { %v469_v24 = vmul.f32 %v355_v22, %v355_v22 }
 0x155   : > { %v358_v29 = vpop.f32.mrf.mxu1 }
 0x156   : > { %v470_v32 = vmul.f32 %v358_v29, %v358_v29 }
 0x15a   : > { %v407_v23 = vpop.f32.mrf.mxu3 }
 0x15b   : > { %v471_v25 = vmul.f32 %v407_v23, %v407_v23  ;;  %v467_v40 = vmul.f32 %v407_v23, %v355_v22 }
 0x15d   : > { %v473_v26 = vadd.f32 %v471_v25, %v469_v24  ;;  %v477_v51 = vmul.f32 2.0, %v467_v40 }
 0x15f   : > { %v487_v27 = vadd.f32 0.0001, %v473_v26  ;;  %v489_v28 = vadd.f32 0.0009, %v473_v26  ;;  %v479_v60 = vadd.f32 0.0001, %v477_v51 }
 0x161   : > { %v491_v30 = vmul.f32 %v489_v28, %v487_v27 }
 0x162   : > { %v410_v31 = vpop.f32.mrf.mxu3 }
 0x163   : > { %763 = vrcp.f32 %v491_v30  ;;  %v472_v33 = vmul.f32 %v410_v31, %v410_v31  ;;  %v461_v34 = vpop.f32.mrf.mxu2  ;;  %v468_v42 = vmul.f32 %v410_v31, %v358_v29  ;;  %v502_v52 = vand.u32 2147483647, %v491_v30 }
 0x164   : > { %v475_v43 = vsub.f32 %v461_v34, %v467_v40  ;;  %v504_v53 = vand.u32 2147483648, %v491_v30  ;;  %vm498_vm3 = vweird.f32 %v491_v30 }
 0x165   : > { %v474_v35 = vadd.f32 %v472_v33, %v470_v32  ;;  %v478_v56 = vmul.f32 2.0, %v468_v42  ;;  %vm503_vm5 = vcmp.eq.f32.partialorder %v502_v52, 8.507059e+37 }
 0x166   : > { %v481_v48 = vmul.f32 2.0, %v475_v43  ;;  %v505_v61 = vor.u32 1.1754944e-38, %v504_v53 }
 0x167   : > { %v488_v36 = vadd.f32 0.0001, %v474_v35  ;;  %v490_v37 = vadd.f32 0.0009, %v474_v35  ;;  %v480_v3 = vadd.f32 0.0001, %v478_v56 }
 0x168   : > { %v483_v57 = vadd.f32 0.0009, %v481_v48 }
 0x169   : > { %v764_v38 = vpop.eup %763  ;;  %v492_v39 = vmul.f32 %v490_v37, %v488_v36 }
 0x16a   : > { %v494_v41 = vmul.f32 %v764_v38, %v491_v30  ;;  %vm499_vm2 = vweird.f32 %v764_v38  ;;  %v485_v4 = vmul.f32 %v483_v57, %v479_v60 }
 0x16b   : > { %765 = vrcp.f32 %v492_v39  ;;  %v464_v44 = vpop.f32.mrf.mxu2  ;;  %vm500_vm4 = vmor %vm498_vm3, %vm499_vm2  ;;  %v518_v62 = vand.u32 2147483648, %v492_v39  ;;  %v516_v1 = vand.u32 2147483647, %v492_v39  ;;  %vm512_vm7 = vweird.f32 %v492_v39 }
 0x16c   : > { %v495_v45 = vsub.f32 1.0, %v494_v41  ;;  %v476_v46 = vsub.f32 %v464_v44, %v468_v42 }
 0x16d   : > { %v519_v6 = vor.u32 1.1754944e-38, %v518_v62  ;;  %vm517_vm9 = vcmp.eq.f32.partialorder %v516_v1, 8.507059e+37 }
 0x16e   : > { %v496_v47 = vmul.f32 %v764_v38, %v495_v45  ;;  %v482_v54 = vmul.f32 2.0, %v476_v46 }
 0x170   : > { %v497_v49 = vadd.f32 %v764_v38, %v496_v47  ;;  %v484_v63 = vadd.f32 0.0009, %v482_v54 }
 0x171   : > { %v766_v50 = vpop.eup %765 }
 0x172   : > { %v508_v55 = vmul.f32 %v766_v50, %v492_v39  ;;  %v501_v58 = vsel %vm500_vm4, %v764_v38, %v497_v49  ;;  %vm513_vm6 = vweird.f32 %v766_v50  ;;  %v486_v7 = vmul.f32 %v484_v63, %v480_v3 }
 0x173   : > { %v506_v2 = vsel %vm503_vm5, %v505_v61, %v501_v58  ;;  %vm514_vm8 = vmor %vm512_vm7, %vm513_vm6 }
 0x174   : > { %v509_v59 = vsub.f32 1.0, %v508_v55  ;;  %v521_v9 = vmul.f32 %v506_v2, %v485_v4 }
 0x176   : > { %v510_v0 = vmul.f32 %v766_v50, %v509_v59  ;;  %v523_v12 = vsel %vm331_vm1, %v521_v9, 0.0 }
 0x178   : > { %v511_v5 = vadd.f32 %v766_v50, %v510_v0 }
 0x17a   : > { %v515_v8 = vsel %vm514_vm8, %v766_v50, %v511_v5 }
 0x17b   : > { %v520_v10 = vsel %vm517_vm9, %v519_v6, %v515_v8 }
 0x17c   : > { %v522_v11 = vmul.f32 %v520_v10, %v486_v7 }
 0x17e   : > { %v524_v13 = vsel %vm331_vm1, %v522_v11, 0.0 }
 0x17f   : > { %v525_v14 = vadd.f32 %v524_v13, %v523_v12 }
 0x181   : > { %526 = vadd.xlane.f32.xlu0 %v525_v14 }
 0x1f4   : > { %v527_v15 = vpop.xlane.xlu0 %526 }
 0x1f5   : > { %v528_v16 = vrot.slane %v527_v15, 4 }
 0x1f7   : > { %v529_v17 = vadd.f32 %v528_v16, %v527_v15 }
 0x1f9   : > { %v530_v18 = vrot.slane %v529_v17, 2 }
 0x1fb   : > { %v531_v19 = vadd.f32 %v530_v18, %v529_v17 }
 0x1fd   : > { %v532_v20 = vrot.slane %v531_v19, 1 }
 0x1ff   : > { %v533_v21 = vadd.f32 %v532_v20, %v531_v19 }
 0x201   : > { %687 = vpush %v533_v21 }
 0x232   : > { %s688_s23 = spop %687 }
 0x233   : > { %v535_v22 = vstv %s688_s23 }
 0x234   : > { %536 = vst [vmem:[%s286_s7] sm:$0x1] %v535_v22 }
 0x235   : > { %914 = shalt.err (!%p911_p0)
}
 0x236   : > { %701 = dma.vmem_to_hbm [thread:$0]  (%p1068_p7), %s549_s11, 16, %s551_s25, %s538_s8  }
 0x237 PF: > { %s562_s20 = sand.u32 1, %s949_s15   ;;  %p1235_p3 = scmp.ge.s32.totalorder %s961_s18, 2 }
 0x238   : > { %s563_s1 = scalar_lea.sflag [#allocation4], %s562_s20 }
 0x239   : > { %p718_p12 = pnand %p1235_p3, %p1027_p6 }
 0x23b   : > { %p719_p5 = pneg %p718_p12 }
 0x23d   : > { %944 = dma.done.wait (%p719_p5), %s563_s1, 16  }
 0x23e   : > { %946 = vsyncadd (%p719_p5), %s563_s1, 4294967280  ;;  %s1236_s0 = sld [smem:[#allocation14_spill]]  ;;  %p16_p1 = scmp.ge.s32.totalorder %s1049_s30, 4  }
 0x23f   : > { %s1237_s15 = smov %s953_s16  ;;  %s1238_s16 = smov %s957_s17 }
 0x240   : > { %s1240_s18 = smov %s1049_s30  ;;  %18 = sbr.rel (!%p16_p1) target bundleno = 9 (0x9), region = 99 }
 0x244   : > { %s1239_s17 = smov %s1236_s0 }
 0x245   :  { %568 = vsyncpa [#allocation3], 1 }
 0x246   :  { %570 = vsyncpa [#allocation3 + $0x1], 1 }
 0x247   :  { %571 = vsyncpa [#allocation6], 1 }
 0x248   :  { %572 = vsyncpa [#allocation4], 1 }
 0x249   :  { %574 = vsyncpa [#allocation4 + $0x1], 1 }

</bundles_post_ra>
